<compile_context>
chip_gen: v7x
topology: tpu7x:2x2x1
jax: 0.10.0
libtpu: 0.0.40
codegen_flags: <defaults>
</compile_context>

<pallas_src>
import jax
import jax.numpy as jnp
from jax.experimental import pallas as pl
from jax.experimental.pallas import tpu as pltpu


def _round_up(x, m):
    return (x + m - 1) // m * m


def _fused_linear_kernel(x_ref, w_ref, b_ref, out_ref):
    # x_ref:   [tile_m, D]      f32 input tile (streamed over the grid)
    # w_ref:   [D, K_pad]       bf16 fused weight (resident, single-buffered)
    # b_ref:   [1, K_pad]       f32 fused bias    (resident, single-buffered)
    # out_ref: [tile_m, K_pad]  bf16 lane-dense output slab
    x_bf16 = x_ref[...].astype(jnp.bfloat16)       # in-kernel cast: free filler
    acc = jnp.dot(x_bf16, w_ref[...], preferred_element_type=jnp.float32)
    out_ref[...] = (acc + b_ref[...]).astype(out_ref.dtype)


def pack_stacked_ensemble_params(base_w, base_b, w_meta, b_meta, *, lane=128):
    """Fuse (stacked base linears) -> (meta linear) into one [D, K_pad] affine map.

    base_w: [M, K, D]  torch nn.Linear weights of the M base models ([out, in])
    base_b: [M, K]     their biases
    w_meta: [K, M*K]   meta-head weight (torch convention [out, in])
    b_meta: [K]        meta-head bias
    """
    M, K, D = base_w.shape
    # Horizontal stack: W_all[:, m*K + k] = base_w[m, k, :] ==> one matmul
    # reproduces torch.cat([model_m(x)], dim=1) exactly.
    w_all = jnp.transpose(base_w, (2, 0, 1)).reshape(D, M * K)    # [D, M*K]
    b_all = base_b.reshape(M * K)                                 # [M*K]
    w_meta_t = w_meta.T                                           # [M*K, K]
    # Exact affine fusion, done once on the host in f32.
    w_fused = w_all @ w_meta_t                                    # [D, K]
    b_fused = b_all @ w_meta_t + b_meta                           # [K]
    # Lane-dense 128-wide output slab (unmasked full-lane stores).  Keep 128
    # even on the 256-wide-MXU generations: the kernel is memory-bound, wider
    # only adds useless output writeback.
    K_pad = _round_up(K, lane)
    w_pad = jnp.zeros((D, K_pad), jnp.float32).at[:, :K].set(w_fused)
    b_pad = jnp.zeros((1, K_pad), jnp.float32).at[:, :K].set(b_fused)
    # bf16 weight with f32 accumulation: native MXU fast path, half the DMA.
    return w_pad.astype(jnp.bfloat16), b_pad, K


def stacked_ensemble_forward(x_nchw, w_fused, b_fused, num_classes, *, tile_m=512):
    """x_nchw: [B, C, H, W] float32.  Returns [B, num_classes] f32 logits."""
    B = x_nchw.shape[0]
    D, K_pad = w_fused.shape

    # Row-major flatten (== torch.flatten(x, 1)): a reshape only, no HBM copy,
    # and no dtype cast here (the kernel casts to bf16 on the fly).
    x_flat = x_nchw.reshape(B, D)
    # TODO(synk): if D were not a multiple of 128 we could zero-pad the feature
    # dim when packing the weight, but matching x would force a full HBM copy;
    # the kernel is mem-bound, so the slightly ragged contraction is preferred.

    # Batch tiling.  A block whose leading dim equals the full batch, or is a
    # multiple of 8 (f32 sublanes), is layout-legal; a ragged last block is
    # handled by Pallas (OOB reads are don't-care rows, OOB writes dropped),
    # so no padded copy of x is ever materialized.
    if B <= tile_m:
        tile_m = B
    else:
        tile_m = _round_up(tile_m, 8)

    # Generation-aware VMEM budget: shrink tile_m to fit (with headroom for
    # compiler-internal scratch) rather than over-request vmem_limit_bytes.
    try:
        vmem_cap = int(pltpu.get_tpu_info().vmem_capacity_bytes)
    except Exception:
        vmem_cap = 64 << 20                        # conservative (v7x per-core)
    budget = max(vmem_cap - (8 << 20), 8 << 20)

    def vmem_need(tm):
        return (D * K_pad * 2 + K_pad * 4          # resident W (bf16) + bias (f32)
                + 2 * tm * D * 4                   # double-buffered f32 x tiles
                + 2 * tm * K_pad * 2)              # double-buffered bf16 out tiles

    while vmem_need(tile_m) > budget and tile_m > 8:
        tile_m = _round_up(max(tile_m // 2, 8), 8)
    # TODO(synk): if D ever grows so large that the resident weight alone blows
    # the budget, add a D-axis grid dimension with an f32 accumulator + pl.when.

    num_tiles = pl.cdiv(B, tile_m)

    params = {}
    # Only shard the batch axis across v7x's two TensorCores when x traffic
    # dominates the (then duplicated) resident-weight DMA; on the single-core
    # v5e/v6e "arbitrary" costs nothing either way.
    params["dimension_semantics"] = (
        ("parallel",) if num_tiles >= 4 else ("arbitrary",))
    need = vmem_need(tile_m)
    if need > (16 << 20):                          # above the smallest default scoped VMEM
        params["vmem_limit_bytes"] = min(need + (8 << 20), vmem_cap)

    cost = pl.CostEstimate(
        flops=2 * B * D * K_pad,
        transcendentals=0,
        bytes_accessed=B * D * 4 + D * K_pad * 2 + B * K_pad * 2 + K_pad * 4)

    def build(single_buffer_resident):
        resident_kwargs = (
            dict(pipeline_mode=pl.Buffered(1)) if single_buffer_resident else {})
        return pl.pallas_call(
            _fused_linear_kernel,
            out_shape=jax.ShapeDtypeStruct((B, K_pad), jnp.bfloat16),
            grid_spec=pltpu.PrefetchScalarGridSpec(
                num_scalar_prefetch=0,
                grid=(num_tiles,),
                in_specs=[
                    pl.BlockSpec((tile_m, D), lambda i: (i, 0)),     # streamed x
                    pl.BlockSpec((D, K_pad), lambda i: (0, 0),       # resident W
                                 **resident_kwargs),
                    pl.BlockSpec((1, K_pad), lambda i: (0, 0),       # resident b
                                 **resident_kwargs),
                ],
                out_specs=pl.BlockSpec((tile_m, K_pad), lambda i: (i, 0)),
            ),
            compiler_params=pltpu.CompilerParams(**params),
            cost_estimate=cost,
        )

    try:
        # Single-buffer the grid-invariant weight/bias (halves their VMEM).
        out_pad = build(True)(x_flat, w_fused, b_fused)
    except Exception:
        # Fallback for JAX versions without pipeline_mode=pl.Buffered support.
        out_pad = build(False)(x_flat, w_fused, b_fused)

    return out_pad[:B, :num_classes].astype(jnp.float32)


def reference_forward(x_nchw, base_w, base_b, w_meta, b_meta):
    """Pure-JAX f32 mirror of the PyTorch StackedEnsemble forward."""
    B = x_nchw.shape[0]
    x_flat = x_nchw.reshape(B, -1)
    logits = [x_flat @ base_w[m].T + base_b[m] for m in range(base_w.shape[0])]
    cat = jnp.concatenate(logits, axis=1)
    return cat @ w_meta.T + b_meta


if __name__ == "__main__":
    # Small shapes consistent with the module's forward.
    B, C, H, W = 2, 4, 16, 16          # NCHW input
    M = 3                               # number of base models in the ensemble
    K = 8                               # classes per base model / meta output
    D = C * H * W

    key = jax.random.PRNGKey(0)
    k_x, k_w, k_b, k_wm, k_bm = jax.random.split(key, 5)

    x = jax.random.normal(k_x, (B, C, H, W), dtype=jnp.float32)

    # Base-model params, torch nn.Linear convention: weight [K, D], bias [K].
    base_w = jax.random.normal(k_w, (M, K, D), dtype=jnp.float32) * 0.02
    base_b = jax.random.normal(k_b, (M, K), dtype=jnp.float32) * 0.02
    # Meta head: Linear(M*K -> K).
    w_meta = jax.random.normal(k_wm, (K, M * K), dtype=jnp.float32) * 0.1
    b_meta = jax.random.normal(k_bm, (K,), dtype=jnp.float32) * 0.1

    w_fused, b_fused, num_classes = pack_stacked_ensemble_params(
        base_w, base_b, w_meta, b_meta)
    out = stacked_ensemble_forward(x, w_fused, b_fused, num_classes)
    out = jax.block_until_ready(out)

    ref = reference_forward(x, base_w, base_b, w_meta, b_meta)

    assert out.shape == (B, K)
    # bf16 inputs/weights/output with f32 accumulation: looser tolerance vs f32.
    assert jnp.allclose(out, ref, atol=2e-2, rtol=2e-2), "mismatch vs reference"
    print("KERNEL_OK")
</pallas_src>

<mosaic_0001>
module attributes {stable_mosaic.version = 11 : i64} {
  func.func @_fused_linear_kernel(%arg0: i32, %arg1: memref<2x1024xf32, #tpu.memory_space<vmem>>, %arg2: memref<1024x128xbf16, #tpu.memory_space<vmem>>, %arg3: memref<1x128xf32, #tpu.memory_space<vmem>>, %arg4: memref<2x128xbf16, #tpu.memory_space<vmem>>) attributes {dimension_semantics = [#tpu.dimension_semantics<arbitrary>], iteration_bounds = array<i64: 1>, scalar_prefetch = 0 : i64, scratch_operands = 0 : i64, tpu.core_type = #tpu.core_type<tc>, window_params = [{transform_indices = @transform_0, window_bounds = array<i64: 2, 1024>}, {pipeline_mode = #tpu.pipeline_mode<synchronous>, transform_indices = @transform_1, window_bounds = array<i64: 1024, 128>}, {pipeline_mode = #tpu.pipeline_mode<synchronous>, transform_indices = @transform_2, window_bounds = array<i64: 1, 128>}, {transform_indices = @transform_3, window_bounds = array<i64: 2, 128>}]} {
    %c0 = arith.constant 0 : index
    %c0_0 = arith.constant 0 : index
    %0 = vector.load %arg1[%c0, %c0_0] : memref<2x1024xf32, #tpu.memory_space<vmem>>, vector<2x1024xf32>
    %1 = arith.truncf %0 : vector<2x1024xf32> to vector<2x1024xbf16>
    %c0_1 = arith.constant 0 : index
    %c0_2 = arith.constant 0 : index
    %2 = vector.load %arg2[%c0_1, %c0_2] : memref<1024x128xbf16, #tpu.memory_space<vmem>>, vector<1024x128xbf16>
    %cst = arith.constant dense<0.000000e+00> : vector<2x128xf32>
    %3 = tpu.matmul %1, %2, %cst {dimension_numbers = #tpu.dot_dimension_numbers<[1], [0], [0], [1], [0, 0, 1, 1], [], []>} : vector<2x1024xbf16>, vector<1024x128xbf16>, vector<2x128xf32> -> vector<2x128xf32>
    %c0_3 = arith.constant 0 : index
    %c0_4 = arith.constant 0 : index
    %4 = vector.load %arg3[%c0_3, %c0_4] : memref<1x128xf32, #tpu.memory_space<vmem>>, vector<1x128xf32>
    %5 = vector.broadcast %4 : vector<1x128xf32> to vector<2x128xf32>
    %6 = arith.addf %3, %5 : vector<2x128xf32>
    %7 = arith.truncf %6 : vector<2x128xf32> to vector<2x128xbf16>
    %c0_5 = arith.constant 0 : index
    %c0_6 = arith.constant 0 : index
    %8 = vector.load %arg4[%c0_5, %c0_6] : memref<2x128xbf16, #tpu.memory_space<vmem>>, vector<2x128xbf16>
    tpu.vector_store %arg4[%c0_5, %c0_6], %7 {strides = array<i32>} : memref<2x128xbf16, #tpu.memory_space<vmem>>, vector<2x128xbf16>,
    return
  }
  func.func @transform_0(%arg0: i32) -> (i32, i32) {
    %c0_i32 = arith.constant 0 : i32
    %c0_i32_0 = arith.constant 0 : i32
    return %arg0, %c0_i32 : i32, i32
  }
  func.func @transform_1(%arg0: i32) -> (i32, i32) {
    %c0_i32 = arith.constant 0 : i32
    %c0_i32_0 = arith.constant 0 : i32
    %c0_i32_1 = arith.constant 0 : i32
    return %c0_i32, %c0_i32_0 : i32, i32
  }
  func.func @transform_2(%arg0: i32) -> (i32, i32) {
    %c0_i32 = arith.constant 0 : i32
    %c0_i32_0 = arith.constant 0 : i32
    %c0_i32_1 = arith.constant 0 : i32
    return %c0_i32, %c0_i32_0 : i32, i32
  }
  func.func @transform_3(%arg0: i32) -> (i32, i32) {
    %c0_i32 = arith.constant 0 : i32
    %c0_i32_0 = arith.constant 0 : i32
    return %arg0, %c0_i32 : i32, i32
  }
}

module attributes {stable_mosaic.version = 11 : i64} {
  func.func @_fused_linear_kernel(%arg0: i32, %arg1: memref<2x1024xf32, #tpu.memory_space<vmem>>, %arg2: memref<1024x128xbf16, #tpu.memory_space<vmem>>, %arg3: memref<1x128xf32, #tpu.memory_space<vmem>>, %arg4: memref<2x128xbf16, #tpu.memory_space<vmem>>) attributes {dimension_semantics = [#tpu.dimension_semantics<arbitrary>], iteration_bounds = array<i64: 1>, scalar_prefetch = 0 : i64, scratch_operands = 0 : i64, tpu.core_type = #tpu.core_type<tc>, window_params = [{transform_indices = @transform_0, window_bounds = array<i64: 2, 1024>}, {pipeline_mode = #tpu.pipeline_mode<synchronous>, transform_indices = @transform_1, window_bounds = array<i64: 1024, 128>}, {pipeline_mode = #tpu.pipeline_mode<synchronous>, transform_indices = @transform_2, window_bounds = array<i64: 1, 128>}, {transform_indices = @transform_3, window_bounds = array<i64: 2, 128>}]} {
    %c0 = arith.constant 0 : index
    %c0_0 = arith.constant 0 : index
    %0 = vector.load %arg1[%c0, %c0_0] : memref<2x1024xf32, #tpu.memory_space<vmem>>, vector<2x1024xf32>
    %1 = arith.truncf %0 : vector<2x1024xf32> to vector<2x1024xbf16>
    %c0_1 = arith.constant 0 : index
    %c0_2 = arith.constant 0 : index
    %2 = vector.load %arg2[%c0_1, %c0_2] : memref<1024x128xbf16, #tpu.memory_space<vmem>>, vector<1024x128xbf16>
    %cst = arith.constant dense<0.000000e+00> : vector<2x128xf32>
    %3 = tpu.matmul %1, %2, %cst {dimension_numbers = #tpu.dot_dimension_numbers<[1], [0], [0], [1], [0, 0, 1, 1], [], []>} : vector<2x1024xbf16>, vector<1024x128xbf16>, vector<2x128xf32> -> vector<2x128xf32>
    %c0_3 = arith.constant 0 : index
    %c0_4 = arith.constant 0 : index
    %4 = vector.load %arg3[%c0_3, %c0_4] : memref<1x128xf32, #tpu.memory_space<vmem>>, vector<1x128xf32>
    %5 = vector.broadcast %4 : vector<1x128xf32> to vector<2x128xf32>
    %6 = arith.addf %3, %5 : vector<2x128xf32>
    %7 = arith.truncf %6 : vector<2x128xf32> to vector<2x128xbf16>
    %c0_5 = arith.constant 0 : index
    %c0_6 = arith.constant 0 : index
    %8 = vector.load %arg4[%c0_5, %c0_6] : memref<2x128xbf16, #tpu.memory_space<vmem>>, vector<2x128xbf16>
    tpu.vector_store %arg4[%c0_5, %c0_6], %7 {strides = array<i32>} : memref<2x128xbf16, #tpu.memory_space<vmem>>, vector<2x128xbf16>,
    return
  }
  func.func @transform_0(%arg0: i32) -> (i32, i32) {
    %c0_i32 = arith.constant 0 : i32
    %c0_i32_0 = arith.constant 0 : i32
    return %arg0, %c0_i32 : i32, i32
  }
  func.func @transform_1(%arg0: i32) -> (i32, i32) {
    %c0_i32 = arith.constant 0 : i32
    %c0_i32_0 = arith.constant 0 : i32
    %c0_i32_1 = arith.constant 0 : i32
    return %c0_i32, %c0_i32_0 : i32, i32
  }
  func.func @transform_2(%arg0: i32) -> (i32, i32) {
    %c0_i32 = arith.constant 0 : i32
    %c0_i32_0 = arith.constant 0 : i32
    %c0_i32_1 = arith.constant 0 : i32
    return %c0_i32, %c0_i32_0 : i32, i32
  }
  func.func @transform_3(%arg0: i32) -> (i32, i32) {
    %c0_i32 = arith.constant 0 : i32
    %c0_i32_0 = arith.constant 0 : i32
    return %arg0, %c0_i32 : i32, i32
  }
}

</mosaic_0001>

<bundles_post_ra>
// kernel: tpu_custom_call.1
= control target key start
LH: loop header
LB: loop body
LE: loop exit
PB: predicated region body
PF: predicated region fallthrough
CT: control target
= control target key end

     0   :  { %8 = vsyncpa [#allocation3], 0  ;;  %s1168_s0 = inlined_call_operand.hbm [shape: f32[2,1024], index: 0, kind: input, shape index: {}]   ;;  %s1169_s1 = inlined_call_operand.hbm [shape: bf16[1024,128], index: 1, kind: input, shape index: {}]   ;;  %s1170_s2 = inlined_call_operand.vmem [shape: f32[1,128], index: 2, kind: input, shape index: {}]   ;;  %s1171_s3 = inlined_call_operand.hbm [shape: bf16[2,128], index: 3, kind: output, shape index: {}]  }
   0x1   :  { %9 = vsyncpa [#allocation6], 0 }
   0x2   :  { %10 = vsyncpa [#allocation4], 0  ;;  %s1090_s12 = smov [#allocation2]   ;;  %s1091_s14 = smov [#allocation5]  }
   0x3   :  { %s17_s13 = sshll.u32 %s1090_s12, 4  ;;  %s26_s15 = sshll.u32 %s1091_s14, 4  ;;  %s18_s13 = int_to_ptr.vmem [resolvable:$true] %s17_s13  ;;  %s1116_s15 = int_to_ptr.vmem [resolvable:$true] %s26_s15 }
   0x4   :  { %s1018_s18 = scalar_lea.hbm %s1168_s0, 256 }
   0x5   :  { %p1019_p0 = scmp.ne.s32.totalorder %s1168_s0, %s1018_s18  ;;  %p1022_p1 = scmp.lt.u32.totalorder %s1018_s18, %s1168_s0 }
   0x7   :  { %p1024_p2 = pnand %p1022_p1, %p1019_p0 }
   0x9   :  { %1027 = shalt.err (!%p1024_p2)
}
   0xa   :  { %s1028_s23 = scalar_lea.vmem %s18_s13, 256  ;;  %p1033_p4 = scmp.lt.s32.totalorder %s18_s13, %s18_s13 }
   0xb   :  { %p1029_p3 = scmp.ne.s32.totalorder %s18_s13, %s1028_s23  ;;  %p1034_p5 = scmp.lt.s32.totalorder %s1028_s23, %s1028_s23 }
   0xd   :  { %p1035_p6 = por %p1034_p5, %p1033_p4 }
   0xf   :  { %p1036_p7 = pnand %p1035_p6, %p1029_p3 }
  0x11   :  { %1039 = shalt.err (!%p1036_p7)
}
  0x12   :  { %20 = dma.hbm_to_vmem [thread:$0]  %s1168_s0, 256, %s18_s13, [#allocation3]  }
  0x13   :  { %s1040_s28 = scalar_lea.hbm %s1169_s1, 8192 }
  0x14   :  { %p1041_p8 = scmp.ne.s32.totalorder %s1169_s1, %s1040_s28  ;;  %p1044_p9 = scmp.lt.u32.totalorder %s1040_s28, %s1169_s1 }
  0x16   :  { %p1046_p10 = pnand %p1044_p9, %p1041_p8 }
  0x18   :  { %1049 = shalt.err (!%p1046_p10)
}
  0x19   :  { %s1050_s6 = scalar_lea.vmem %s1116_s15, 8192  ;;  %p1055_p12 = scmp.lt.s32.totalorder %s1116_s15, %s1116_s15 }
  0x1a   :  { %p1051_p11 = scmp.ne.s32.totalorder %s1116_s15, %s1050_s6  ;;  %p1056_p13 = scmp.lt.s32.totalorder %s1050_s6, %s1050_s6 }
  0x1c   :  { %p1057_p0 = por %p1056_p13, %p1055_p12 }
  0x1e   :  { %p1058_p1 = pnand %p1057_p0, %p1051_p11 }
  0x20   :  { %1061 = shalt.err (!%p1058_p1)
}
  0x21   :  { %s1092_s0 = smov 64   ;;  %s1093_s7 = smov 4  }
  0x22   :  { %32 = dma.hbm_to_vmem [thread:$0]  %s1169_s1, 8192, %s1116_s15, [#allocation6], %s1092_s0, %s1092_s0, %s1093_s7  }
  0x23   :  { %1084 = dma.done.wait [#allocation3], 256  }
  0x24   :  { %1085 = vsyncadd [#allocation3], 4294967040 }
  0x25   :  { %1086 = dma.done.wait [#allocation6], 8192  }
  0x26   :  { %1087 = vsyncadd [#allocation6], 4294959104  ;;  %v952_v0 = vld [vmem:[#allocation5 + $0x40] sm:$0xff]   ;;  %v956_v4 = vld [vmem:[#allocation5 + $0x48] sm:$0xff]   ;;  %v1094_v22 = vmov 1983009808   ;;  %v50_v24 = vlaneseq }
  0x27   :  { %v953_v1 = vld [vmem:[#allocation5 + $0xc0] sm:$0xff]   ;;  %858 = vmatprep.subr.bf16.mxu0 %v952_v0  ;;  %v957_v5 = vld [vmem:[#allocation5 + $0xc8] sm:$0xff]   ;;  %v960_v8 = vld [vmem:[#allocation5 + $0x50] sm:$0xff]   ;;  %v48_v23 = vunpack.c.l.s4 %v1094_v22 }
  0x28   :  { %v954_v2 = vld [vmem:[#allocation5] sm:$0xff]   ;;  %880 = vmatprep.subr.bf16.mxu1 %v953_v1  ;;  %v958_v6 = vld [vmem:[#allocation5 + $0x8] sm:$0xff]   ;;  %v961_v9 = vld [vmem:[#allocation5 + $0xd0] sm:$0xff]   ;;  %v51_v30 = vshrl.u32 %v50_v24, 7 }
  0x29   :  { %v955_v3 = vld [vmem:[#allocation5 + $0x80] sm:$0xff]   ;;  %859 = vmatpush3.bf16.msra.mxu0 %v954_v2  ;;  %v959_v7 = vld [vmem:[#allocation5 + $0x88] sm:$0xff]   ;;  %v962_v10 = vld [vmem:[#allocation5 + $0x10] sm:$0xff]   ;;  %v49_v29 = vunpack.c.0.s8 %v48_v23 }
  0x2a   :  { %881 = vmatpush3.bf16.msra.mxu1 %v955_v3  ;;  %860 = vmatprep.subr.bf16.mxu0 %v956_v4  ;;  %v963_v11 = vld [vmem:[#allocation5 + $0x90] sm:$0xff]   ;;  %v964_v12 = vld [vmem:[#allocation5 + $0x58] sm:$0xff]   ;;  %v968_v16 = vld [vmem:[#allocation5 + $0x60] sm:$0xff]  }
  0x2b   :  { %882 = vmatprep.subr.bf16.mxu1 %v957_v5  ;;  %v965_v13 = vld [vmem:[#allocation5 + $0xd8] sm:$0xff]   ;;  %v969_v17 = vld [vmem:[#allocation5 + $0xe0] sm:$0xff]   ;;  %v972_v20 = vld [vmem:[#allocation5 + $0x68] sm:$0xff]   ;;  %v1147_v35 = vsub.s32 %v49_v29, %v51_v30 }
  0x2c   :  { %v966_v14 = vld [vmem:[#allocation5 + $0x18] sm:$0xff]   ;;  %v970_v18 = vld [vmem:[#allocation5 + $0x20] sm:$0xff]   ;;  %v973_v21 = vld [vmem:[#allocation5 + $0xe8] sm:$0xff]  }
  0x2d   :  { %861 = vmatpush3.bf16.msra.mxu0 %v958_v6  ;;  %v967_v15 = vld [vmem:[#allocation5 + $0x98] sm:$0xff]   ;;  %v971_v19 = vld [vmem:[#allocation5 + $0xa0] sm:$0xff]   ;;  %v974_v25 = vld [vmem:[#allocation5 + $0x28] sm:$0xff]  }
  0x2e   :  { %883 = vmatpush3.bf16.msra.mxu1 %v959_v7  ;;  %862 = vmatprep.subr.bf16.mxu0 %v960_v8  ;;  %v975_v26 = vld [vmem:[#allocation5 + $0xa8] sm:$0xff]   ;;  %v976_v27 = vld [vmem:[#allocation5 + $0x70] sm:$0xff]   ;;  %v980_v33 = vld [vmem:[#allocation5 + $0x78] sm:$0xff]  }
  0x2f   :  { %884 = vmatprep.subr.bf16.mxu1 %v961_v9  ;;  %v977_v28 = vld [vmem:[#allocation5 + $0xf0] sm:$0xff]   ;;  %v981_v34 = vld [vmem:[#allocation5 + $0xf8] sm:$0xff]   ;;  %v985_v41 = vld [vmem:[#allocation5 + $0x140] sm:$0xff]  }
  0x30   :  { %v978_v31 = vld [vmem:[#allocation5 + $0x30] sm:$0xff]   ;;  %v982_v36 = vld [vmem:[#allocation5 + $0x38] sm:$0xff]   ;;  %v986_v42 = vld [vmem:[#allocation5 + $0x1c0] sm:$0xff]  }
  0x31   :  { %863 = vmatpush3.bf16.msra.mxu0 %v962_v10  ;;  %v979_v32 = vld [vmem:[#allocation5 + $0xb0] sm:$0xff]   ;;  %v983_v37 = vld [vmem:[#allocation5 + $0xb8] sm:$0xff]   ;;  %v987_v48 = vld [vmem:[#allocation5 + $0x100] sm:$0xff]  }
  0x32   :  { %885 = vmatpush3.bf16.msra.mxu1 %v963_v11  ;;  %864 = vmatprep.subr.bf16.mxu0 %v964_v12  ;;  %v42_v38 = vld [vmem:[#allocation2] sm:$0xff]  ;;  %v989_v50 = vld [vmem:[#allocation5 + $0x148] sm:$0xff]   ;;  %v988_v52 = vld [vmem:[#allocation5 + $0x180] sm:$0xff]  }
  0x33   :  { %886 = vmatprep.subr.bf16.mxu1 %v965_v13  ;;  %v53_v39 = vrot.slane %v42_v38, %v1147_v35  ;;  %v46_v40 = vcombine.high %v42_v38, %v42_v38  ;;  %v990_v53 = vld [vmem:[#allocation5 + $0x1c8] sm:$0xff]   ;;  %v993_v55 = vld [vmem:[#allocation5 + $0x150] sm:$0xff]   ;;  %v997_v59 = vld [vmem:[#allocation5 + $0x158] sm:$0xff]  }
  0x34   :  { %v991_v54 = vld [vmem:[#allocation5 + $0x108] sm:$0xff]   ;;  %v994_v57 = vld [vmem:[#allocation5 + $0x1d0] sm:$0xff]   ;;  %v998_v61 = vld [vmem:[#allocation5 + $0x1d8] sm:$0xff]  }
  0x35   :  { %865 = vmatpush3.bf16.msra.mxu0 %v966_v14  ;;  %v61_v43 = vcombine.high %v53_v39, %v53_v39  ;;  %v60_v44 = vrot.slane %v46_v40, %v1147_v35  ;;  %v88_v45 = vpack.c.bf16 %v53_v39, %v53_v39  ;;  %v992_v56 = vld [vmem:[#allocation5 + $0x188] sm:$0xff]   ;;  %v995_v58 = vld [vmem:[#allocation5 + $0x110] sm:$0xff]   ;;  %v999_v62 = vld [vmem:[#allocation5 + $0x118] sm:$0xff]  }
  0x36   :  { %887 = vmatpush3.bf16.msra.mxu1 %v967_v15  ;;  %866 = vmatprep.subr.bf16.mxu0 %v968_v16  ;;  %v996_v60 = vld [vmem:[#allocation5 + $0x190] sm:$0xff]   ;;  %v1001_v63 = vld [vmem:[#allocation5 + $0x160] sm:$0xff]   ;;  %v1000_v0 = vld [vmem:[#allocation5 + $0x198] sm:$0xff]  }
  0x37   :  { %888 = vmatprep.subr.bf16.mxu1 %v969_v17  ;;  %v89_v46 = vpack.c.bf16 %v61_v43, %v61_v43  ;;  %v62_v47 = vcombine.high %v60_v44, %v60_v44  ;;  %v90_v49 = vpack.c.bf16 %v60_v44, %v60_v44  ;;  %v1002_v1 = vld [vmem:[#allocation5 + $0x1e0] sm:$0xff]   ;;  %v1005_v3 = vld [vmem:[#allocation5 + $0x168] sm:$0xff]   ;;  %v1009_v7 = vld [vmem:[#allocation5 + $0x170] sm:$0xff]  }
  0x38   :  { %v1003_v2 = vld [vmem:[#allocation5 + $0x120] sm:$0xff]   ;;  %v1006_v5 = vld [vmem:[#allocation5 + $0x1e8] sm:$0xff]   ;;  %v1010_v9 = vld [vmem:[#allocation5 + $0x1f0] sm:$0xff]  }
  0x39   :  { %867 = vmatpush3.bf16.msra.mxu0 %v970_v18  ;;  %647 = vmatprep.mubr.bf16.mxu0 %v89_v46  ;;  %v91_v51 = vpack.c.bf16 %v62_v47, %v62_v47  ;;  %v1004_v4 = vld [vmem:[#allocation5 + $0x1a0] sm:$0xff]   ;;  %v1007_v6 = vld [vmem:[#allocation5 + $0x128] sm:$0xff]   ;;  %v1011_v10 = vld [vmem:[#allocation5 + $0x130] sm:$0xff]  }
  0x3a   :  { %889 = vmatpush3.bf16.msra.mxu1 %v971_v19  ;;  %868 = vmatprep.subr.bf16.mxu0 %v972_v20  ;;  %v1008_v8 = vld [vmem:[#allocation5 + $0x1a8] sm:$0xff]   ;;  %v1013_v11 = vld [vmem:[#allocation5 + $0x178] sm:$0xff]   ;;  %v1012_v12 = vld [vmem:[#allocation5 + $0x1b0] sm:$0xff]  }
  0x3b   :  { %890 = vmatprep.subr.bf16.mxu1 %v973_v21  ;;  %687 = vmatprep.mubr.bf16.mxu1 %v91_v51  ;;  %v1014_v13 = vld [vmem:[#allocation5 + $0x1f8] sm:$0xff]  }
  0x3c   :  { %v43_v14 = vld [vmem:[#allocation2 + $0x8] sm:$0xff] }
  0x3d   :  { %869 = vmatpush3.bf16.msra.mxu0 %v974_v25  ;;  %v1015_v15 = vld [vmem:[#allocation5 + $0x138] sm:$0xff]   ;;  %v70_v16 = vrot.slane %v43_v14, %v1147_v35  ;;  %v63_v17 = vcombine.high %v43_v14, %v43_v14 }
  0x3e   :  { %891 = vmatpush3.bf16.msra.mxu1 %v975_v26  ;;  %870 = vmatprep.subr.bf16.mxu0 %v976_v27  ;;  %v1016_v18 = vld [vmem:[#allocation5 + $0x1b8] sm:$0xff]   ;;  %v793_v27 = vld [vmem:[%s1170_s2] ss:$0 sm:$0xff]  ;;  %s1095_s2 = smov [#allocation7]  }
  0x3f   :  { %892 = vmatprep.subr.bf16.mxu1 %v977_v28  ;;  %v78_v19 = vcombine.high %v70_v16, %v70_v16  ;;  %v77_v20 = vrot.slane %v63_v17, %v1147_v35  ;;  %v92_v21 = vpack.c.bf16 %v70_v16, %v70_v16  ;;  %s783_s11 = sshll.u32 %s1095_s2, 4  ;;  %s784_s11 = int_to_ptr.vmem [resolvable:$true] %s783_s11 }
  0x40   :  { %s1062_s12 = scalar_lea.vmem %s784_s11, 16  ;;  %s1066_s13 = scalar_lea.vmem %s784_s11, 32 }
  0x41   :  { %871 = vmatpush3.bf16.msra.mxu0 %v978_v31  ;;  %v93_v22 = vpack.c.bf16 %v78_v19, %v78_v19  ;;  %v79_v23 = vcombine.high %v77_v20, %v77_v20  ;;  %v94_v24 = vpack.c.bf16 %v77_v20, %v77_v20  ;;  %p1063_p2 = scmp.ne.s32.totalorder %s784_s11, %s1062_s12  ;;  %p1067_p3 = scmp.lt.s32.totalorder %s784_s11, %s784_s11 }
  0x42   :  { %893 = vmatpush3.bf16.msra.mxu1 %v979_v32  ;;  %872 = vmatprep.subr.bf16.mxu0 %v980_v33  ;;  %p1068_p4 = scmp.lt.s32.totalorder %s1066_s13, %s1062_s12 }
  0x43   :  { %894 = vmatprep.subr.bf16.mxu1 %v981_v34  ;;  %v95_v25 = vpack.c.bf16 %v79_v23, %v79_v23 }
  0x44   :  { %p1069_p5 = por %p1068_p4, %p1067_p3 }
  0x45   :  { %873 = vmatpush3.bf16.msra.mxu0 %v982_v36 }
  0x46   :  { %895 = vmatpush3.bf16.msra.mxu1 %v983_v37  ;;  %902 = vmatprep.subr.bf16.mxu0 %v985_v41  ;;  %p1070_p6 = pnand %p1069_p5, %p1063_p2 }
  0x47   :  { %924 = vmatprep.subr.bf16.mxu1 %v986_v42 }
  0x48   :  { %648 = vmatmul.mubr.bf16.vlgmr.msra.gmra.mrb[0].mxu0 %v88_v45 }
  0x49   :  { %903 = vmatpush3.bf16.msra.mxu0 %v987_v48  ;;  %688 = vmatmul.mubr.bf16.vlgmr.msra.gmra.mrb[0].mxu1 %v90_v49 }
  0x4a   :  { %904 = vmatprep.subr.bf16.mxu0 %v989_v50  ;;  %925 = vmatpush3.bf16.msra.mxu1 %v988_v52 }
  0x4b   :  { %926 = vmatprep.subr.bf16.mxu1 %v990_v53  ;;  %727 = vmatprep.mubr.bf16.mxu0 %v93_v22 }
  0x4c   :  { %767 = vmatprep.mubr.bf16.mxu1 %v95_v25 }
  0x4d   :  { %905 = vmatpush3.bf16.msra.mxu0 %v991_v54 }
  0x4e   :  { %906 = vmatprep.subr.bf16.mxu0 %v993_v55  ;;  %927 = vmatpush3.bf16.msra.mxu1 %v992_v56 }
  0x4f   :  { %928 = vmatprep.subr.bf16.mxu1 %v994_v57 }
  0x51   :  { %907 = vmatpush3.bf16.msra.mxu0 %v995_v58 }
  0x52   :  { %908 = vmatprep.subr.bf16.mxu0 %v997_v59  ;;  %929 = vmatpush3.bf16.msra.mxu1 %v996_v60 }
  0x53   :  { %930 = vmatprep.subr.bf16.mxu1 %v998_v61 }
  0x55   :  { %909 = vmatpush3.bf16.msra.mxu0 %v999_v62 }
  0x56   :  { %910 = vmatprep.subr.bf16.mxu0 %v1001_v63  ;;  %931 = vmatpush3.bf16.msra.mxu1 %v1000_v0 }
  0x57   :  { %932 = vmatprep.subr.bf16.mxu1 %v1002_v1 }
  0x59   :  { %911 = vmatpush3.bf16.msra.mxu0 %v1003_v2 }
  0x5a   :  { %912 = vmatprep.subr.bf16.mxu0 %v1005_v3  ;;  %933 = vmatpush3.bf16.msra.mxu1 %v1004_v4 }
  0x5b   :  { %934 = vmatprep.subr.bf16.mxu1 %v1006_v5 }
  0x5d   :  { %913 = vmatpush3.bf16.msra.mxu0 %v1007_v6 }
  0x5e   :  { %914 = vmatprep.subr.bf16.mxu0 %v1009_v7  ;;  %935 = vmatpush3.bf16.msra.mxu1 %v1008_v8 }
  0x5f   :  { %936 = vmatprep.subr.bf16.mxu1 %v1010_v9 }
  0x61   :  { %915 = vmatpush3.bf16.msra.mxu0 %v1011_v10 }
  0x62   :  { %916 = vmatprep.subr.bf16.mxu0 %v1013_v11  ;;  %937 = vmatpush3.bf16.msra.mxu1 %v1012_v12 }
  0x63   :  { %938 = vmatprep.subr.bf16.mxu1 %v1014_v13 }
  0x65   :  { %917 = vmatpush3.bf16.msra.mxu0 %v1015_v15 }
  0x66   :  { %939 = vmatpush3.bf16.msra.mxu1 %v1016_v18 }
  0x68   :  { %728 = vmatmul.mubr.bf16.vlgmr.msra.gmra.mrb[4].mxu0 %v92_v21 }
  0x69   :  { %768 = vmatmul.mubr.bf16.vlgmr.msra.gmra.mrb[4].mxu1 %v94_v24 }
 0x11b   :  { %v874_v26 = vpop.f32.mrb[0].mxu0 }
 0x11c   :  { %v875_v28 = vpop.f32.mrb[1].mxu0  ;;  %v896_v29 = vpop.f32.mrb[0].mxu1 }
 0x11d   :  { %v876_v30 = vadd.f32 %v875_v28, %v874_v26  ;;  %v877_v31 = vpop.f32.mrb[2].mxu0  ;;  %v897_v32 = vpop.f32.mrb[1].mxu1 }
 0x11e   :  { %v878_v33 = vpop.f32.mrb[3].mxu0  ;;  %v898_v35 = vadd.f32 %v897_v32, %v896_v29  ;;  %v899_v36 = vpop.f32.mrb[2].mxu1 }
 0x11f   :  { %v650_v34 = vadd.f32 %v876_v30, %v793_v27  ;;  %v900_v37 = vpop.f32.mrb[3].mxu1 }
 0x121   :  { %v690_v38 = vadd.f32 %v898_v35, %v650_v34 }
 0x13b   :  { %v918_v39 = vpop.f32.mrb[4].mxu0 }
 0x13c   :  { %v919_v40 = vpop.f32.mrb[5].mxu0  ;;  %v940_v41 = vpop.f32.mrb[4].mxu1 }
 0x13d   :  { %v920_v42 = vadd.f32 %v919_v40, %v918_v39  ;;  %v921_v43 = vpop.f32.mrb[6].mxu0  ;;  %v941_v44 = vpop.f32.mrb[5].mxu1 }
 0x13e   :  { %v922_v45 = vpop.f32.mrb[7].mxu0  ;;  %v942_v47 = vadd.f32 %v941_v44, %v940_v41  ;;  %v943_v48 = vpop.f32.mrb[6].mxu1 }
 0x13f   :  { %v730_v46 = vadd.f32 %v920_v42, %v690_v38  ;;  %v944_v49 = vpop.f32.mrb[7].mxu1 }
 0x141   :  { %v770_v50 = vadd.f32 %v942_v47, %v730_v46 }
 0x143   :  { %v775_v51 = vpack.c.bf16 %v770_v50, %v770_v50 }
 0x145   :  { %776 = vst [vmem:[#allocation7] sm:$0x1] %v775_v51 }
 0x146   :  { %1073 = shalt.err (!%p1070_p6)
}
 0x147   :  { %s1074_s16 = scalar_lea.hbm %s1171_s3, 16 }
 0x148   :  { %p1075_p7 = scmp.ne.s32.totalorder %s1171_s3, %s1074_s16  ;;  %p1078_p8 = scmp.lt.u32.totalorder %s1074_s16, %s1171_s3 }
 0x14a   :  { %p1080_p9 = pnand %p1078_p8, %p1075_p7 }
 0x14c   :  { %1083 = shalt.err (!%p1080_p9)
}
 0x14d   :  { %786 = dma.vmem_to_hbm [thread:$0]  %s784_s11, 16, %s1171_s3, [#allocation4]  }
 0x14e   :  { %1088 = dma.done.wait [#allocation4], 16  }
 0x14f   :  { %1089 = vsyncadd [#allocation4], 4294967280 }
 0x150   :  { %790 = vsyncpa [#allocation3], 1 }
 0x151   :  { %791 = vsyncpa [#allocation6], 1 }
 0x152   :  { %792 = vsyncpa [#allocation4], 1 }

// kernel: tpu_custom_call.1
= control target key start
LH: loop header
LB: loop body
LE: loop exit
PB: predicated region body
PF: predicated region fallthrough
CT: control target
= control target key end

     0   :  { %8 = vsyncpa [#allocation3], 0  ;;  %s1168_s0 = inlined_call_operand.hbm [shape: f32[2,1024], index: 0, kind: input, shape index: {}]   ;;  %s1169_s1 = inlined_call_operand.hbm [shape: bf16[1024,128], index: 1, kind: input, shape index: {}]   ;;  %s1170_s2 = inlined_call_operand.vmem [shape: f32[1,128], index: 2, kind: input, shape index: {}]   ;;  %s1171_s3 = inlined_call_operand.hbm [shape: bf16[2,128], index: 3, kind: output, shape index: {}]  }
   0x1   :  { %9 = vsyncpa [#allocation6], 0 }
   0x2   :  { %10 = vsyncpa [#allocation4], 0  ;;  %s1090_s12 = smov [#allocation2]   ;;  %s1091_s14 = smov [#allocation5]  }
   0x3   :  { %s17_s13 = sshll.u32 %s1090_s12, 4  ;;  %s26_s15 = sshll.u32 %s1091_s14, 4  ;;  %s18_s13 = int_to_ptr.vmem [resolvable:$true] %s17_s13  ;;  %s1116_s15 = int_to_ptr.vmem [resolvable:$true] %s26_s15 }
   0x4   :  { %s1018_s18 = scalar_lea.hbm %s1168_s0, 256 }
   0x5   :  { %p1019_p0 = scmp.ne.s32.totalorder %s1168_s0, %s1018_s18  ;;  %p1022_p1 = scmp.lt.u32.totalorder %s1018_s18, %s1168_s0 }
   0x7   :  { %p1024_p2 = pnand %p1022_p1, %p1019_p0 }
   0x9   :  { %1027 = shalt.err (!%p1024_p2)
}
   0xa   :  { %s1028_s23 = scalar_lea.vmem %s18_s13, 256  ;;  %p1033_p4 = scmp.lt.s32.totalorder %s18_s13, %s18_s13 }
   0xb   :  { %p1029_p3 = scmp.ne.s32.totalorder %s18_s13, %s1028_s23  ;;  %p1034_p5 = scmp.lt.s32.totalorder %s1028_s23, %s1028_s23 }
   0xd   :  { %p1035_p6 = por %p1034_p5, %p1033_p4 }
   0xf   :  { %p1036_p7 = pnand %p1035_p6, %p1029_p3 }
  0x11   :  { %1039 = shalt.err (!%p1036_p7)
}
  0x12   :  { %20 = dma.hbm_to_vmem [thread:$0]  %s1168_s0, 256, %s18_s13, [#allocation3]  }
  0x13   :  { %s1040_s28 = scalar_lea.hbm %s1169_s1, 8192 }
  0x14   :  { %p1041_p8 = scmp.ne.s32.totalorder %s1169_s1, %s1040_s28  ;;  %p1044_p9 = scmp.lt.u32.totalorder %s1040_s28, %s1169_s1 }
  0x16   :  { %p1046_p10 = pnand %p1044_p9, %p1041_p8 }
  0x18   :  { %1049 = shalt.err (!%p1046_p10)
}
  0x19   :  { %s1050_s6 = scalar_lea.vmem %s1116_s15, 8192  ;;  %p1055_p12 = scmp.lt.s32.totalorder %s1116_s15, %s1116_s15 }
  0x1a   :  { %p1051_p11 = scmp.ne.s32.totalorder %s1116_s15, %s1050_s6  ;;  %p1056_p13 = scmp.lt.s32.totalorder %s1050_s6, %s1050_s6 }
  0x1c   :  { %p1057_p0 = por %p1056_p13, %p1055_p12 }
  0x1e   :  { %p1058_p1 = pnand %p1057_p0, %p1051_p11 }
  0x20   :  { %1061 = shalt.err (!%p1058_p1)
}
  0x21   :  { %s1092_s0 = smov 64   ;;  %s1093_s7 = smov 4  }
  0x22   :  { %32 = dma.hbm_to_vmem [thread:$0]  %s1169_s1, 8192, %s1116_s15, [#allocation6], %s1092_s0, %s1092_s0, %s1093_s7  }
  0x23   :  { %1084 = dma.done.wait [#allocation3], 256  }
  0x24   :  { %1085 = vsyncadd [#allocation3], 4294967040 }
  0x25   :  { %1086 = dma.done.wait [#allocation6], 8192  }
  0x26   :  { %1087 = vsyncadd [#allocation6], 4294959104  ;;  %v952_v0 = vld [vmem:[#allocation5 + $0x40] sm:$0xff]   ;;  %v956_v4 = vld [vmem:[#allocation5 + $0x48] sm:$0xff]   ;;  %v1094_v22 = vmov 1983009808   ;;  %v50_v24 = vlaneseq }
  0x27   :  { %v953_v1 = vld [vmem:[#allocation5 + $0xc0] sm:$0xff]   ;;  %858 = vmatprep.subr.bf16.mxu0 %v952_v0  ;;  %v957_v5 = vld [vmem:[#allocation5 + $0xc8] sm:$0xff]   ;;  %v960_v8 = vld [vmem:[#allocation5 + $0x50] sm:$0xff]   ;;  %v48_v23 = vunpack.c.l.s4 %v1094_v22 }
  0x28   :  { %v954_v2 = vld [vmem:[#allocation5] sm:$0xff]   ;;  %880 = vmatprep.subr.bf16.mxu1 %v953_v1  ;;  %v958_v6 = vld [vmem:[#allocation5 + $0x8] sm:$0xff]   ;;  %v961_v9 = vld [vmem:[#allocation5 + $0xd0] sm:$0xff]   ;;  %v51_v30 = vshrl.u32 %v50_v24, 7 }
  0x29   :  { %v955_v3 = vld [vmem:[#allocation5 + $0x80] sm:$0xff]   ;;  %859 = vmatpush3.bf16.msra.mxu0 %v954_v2  ;;  %v959_v7 = vld [vmem:[#allocation5 + $0x88] sm:$0xff]   ;;  %v962_v10 = vld [vmem:[#allocation5 + $0x10] sm:$0xff]   ;;  %v49_v29 = vunpack.c.0.s8 %v48_v23 }
  0x2a   :  { %881 = vmatpush3.bf16.msra.mxu1 %v955_v3  ;;  %860 = vmatprep.subr.bf16.mxu0 %v956_v4  ;;  %v963_v11 = vld [vmem:[#allocation5 + $0x90] sm:$0xff]   ;;  %v964_v12 = vld [vmem:[#allocation5 + $0x58] sm:$0xff]   ;;  %v968_v16 = vld [vmem:[#allocation5 + $0x60] sm:$0xff]  }
  0x2b   :  { %882 = vmatprep.subr.bf16.mxu1 %v957_v5  ;;  %v965_v13 = vld [vmem:[#allocation5 + $0xd8] sm:$0xff]   ;;  %v969_v17 = vld [vmem:[#allocation5 + $0xe0] sm:$0xff]   ;;  %v972_v20 = vld [vmem:[#allocation5 + $0x68] sm:$0xff]   ;;  %v1147_v35 = vsub.s32 %v49_v29, %v51_v30 }
  0x2c   :  { %v966_v14 = vld [vmem:[#allocation5 + $0x18] sm:$0xff]   ;;  %v970_v18 = vld [vmem:[#allocation5 + $0x20] sm:$0xff]   ;;  %v973_v21 = vld [vmem:[#allocation5 + $0xe8] sm:$0xff]  }
  0x2d   :  { %861 = vmatpush3.bf16.msra.mxu0 %v958_v6  ;;  %v967_v15 = vld [vmem:[#allocation5 + $0x98] sm:$0xff]   ;;  %v971_v19 = vld [vmem:[#allocation5 + $0xa0] sm:$0xff]   ;;  %v974_v25 = vld [vmem:[#allocation5 + $0x28] sm:$0xff]  }
  0x2e   :  { %883 = vmatpush3.bf16.msra.mxu1 %v959_v7  ;;  %862 = vmatprep.subr.bf16.mxu0 %v960_v8  ;;  %v975_v26 = vld [vmem:[#allocation5 + $0xa8] sm:$0xff]   ;;  %v976_v27 = vld [vmem:[#allocation5 + $0x70] sm:$0xff]   ;;  %v980_v33 = vld [vmem:[#allocation5 + $0x78] sm:$0xff]  }
  0x2f   :  { %884 = vmatprep.subr.bf16.mxu1 %v961_v9  ;;  %v977_v28 = vld [vmem:[#allocation5 + $0xf0] sm:$0xff]   ;;  %v981_v34 = vld [vmem:[#allocation5 + $0xf8] sm:$0xff]   ;;  %v985_v41 = vld [vmem:[#allocation5 + $0x140] sm:$0xff]  }
  0x30   :  { %v978_v31 = vld [vmem:[#allocation5 + $0x30] sm:$0xff]   ;;  %v982_v36 = vld [vmem:[#allocation5 + $0x38] sm:$0xff]   ;;  %v986_v42 = vld [vmem:[#allocation5 + $0x1c0] sm:$0xff]  }
  0x31   :  { %863 = vmatpush3.bf16.msra.mxu0 %v962_v10  ;;  %v979_v32 = vld [vmem:[#allocation5 + $0xb0] sm:$0xff]   ;;  %v983_v37 = vld [vmem:[#allocation5 + $0xb8] sm:$0xff]   ;;  %v987_v48 = vld [vmem:[#allocation5 + $0x100] sm:$0xff]  }
  0x32   :  { %885 = vmatpush3.bf16.msra.mxu1 %v963_v11  ;;  %864 = vmatprep.subr.bf16.mxu0 %v964_v12  ;;  %v42_v38 = vld [vmem:[#allocation2] sm:$0xff]  ;;  %v989_v50 = vld [vmem:[#allocation5 + $0x148] sm:$0xff]   ;;  %v988_v52 = vld [vmem:[#allocation5 + $0x180] sm:$0xff]  }
  0x33   :  { %886 = vmatprep.subr.bf16.mxu1 %v965_v13  ;;  %v53_v39 = vrot.slane %v42_v38, %v1147_v35  ;;  %v46_v40 = vcombine.high %v42_v38, %v42_v38  ;;  %v990_v53 = vld [vmem:[#allocation5 + $0x1c8] sm:$0xff]   ;;  %v993_v55 = vld [vmem:[#allocation5 + $0x150] sm:$0xff]   ;;  %v997_v59 = vld [vmem:[#allocation5 + $0x158] sm:$0xff]  }
  0x34   :  { %v991_v54 = vld [vmem:[#allocation5 + $0x108] sm:$0xff]   ;;  %v994_v57 = vld [vmem:[#allocation5 + $0x1d0] sm:$0xff]   ;;  %v998_v61 = vld [vmem:[#allocation5 + $0x1d8] sm:$0xff]  }
  0x35   :  { %865 = vmatpush3.bf16.msra.mxu0 %v966_v14  ;;  %v61_v43 = vcombine.high %v53_v39, %v53_v39  ;;  %v60_v44 = vrot.slane %v46_v40, %v1147_v35  ;;  %v88_v45 = vpack.c.bf16 %v53_v39, %v53_v39  ;;  %v992_v56 = vld [vmem:[#allocation5 + $0x188] sm:$0xff]   ;;  %v995_v58 = vld [vmem:[#allocation5 + $0x110] sm:$0xff]   ;;  %v999_v62 = vld [vmem:[#allocation5 + $0x118] sm:$0xff]  }
  0x36   :  { %887 = vmatpush3.bf16.msra.mxu1 %v967_v15  ;;  %866 = vmatprep.subr.bf16.mxu0 %v968_v16  ;;  %v996_v60 = vld [vmem:[#allocation5 + $0x190] sm:$0xff]   ;;  %v1001_v63 = vld [vmem:[#allocation5 + $0x160] sm:$0xff]   ;;  %v1000_v0 = vld [vmem:[#allocation5 + $0x198] sm:$0xff]  }
  0x37   :  { %888 = vmatprep.subr.bf16.mxu1 %v969_v17  ;;  %v89_v46 = vpack.c.bf16 %v61_v43, %v61_v43  ;;  %v62_v47 = vcombine.high %v60_v44, %v60_v44  ;;  %v90_v49 = vpack.c.bf16 %v60_v44, %v60_v44  ;;  %v1002_v1 = vld [vmem:[#allocation5 + $0x1e0] sm:$0xff]   ;;  %v1005_v3 = vld [vmem:[#allocation5 + $0x168] sm:$0xff]   ;;  %v1009_v7 = vld [vmem:[#allocation5 + $0x170] sm:$0xff]  }
  0x38   :  { %v1003_v2 = vld [vmem:[#allocation5 + $0x120] sm:$0xff]   ;;  %v1006_v5 = vld [vmem:[#allocation5 + $0x1e8] sm:$0xff]   ;;  %v1010_v9 = vld [vmem:[#allocation5 + $0x1f0] sm:$0xff]  }
  0x39   :  { %867 = vmatpush3.bf16.msra.mxu0 %v970_v18  ;;  %647 = vmatprep.mubr.bf16.mxu0 %v89_v46  ;;  %v91_v51 = vpack.c.bf16 %v62_v47, %v62_v47  ;;  %v1004_v4 = vld [vmem:[#allocation5 + $0x1a0] sm:$0xff]   ;;  %v1007_v6 = vld [vmem:[#allocation5 + $0x128] sm:$0xff]   ;;  %v1011_v10 = vld [vmem:[#allocation5 + $0x130] sm:$0xff]  }
  0x3a   :  { %889 = vmatpush3.bf16.msra.mxu1 %v971_v19  ;;  %868 = vmatprep.subr.bf16.mxu0 %v972_v20  ;;  %v1008_v8 = vld [vmem:[#allocation5 + $0x1a8] sm:$0xff]   ;;  %v1013_v11 = vld [vmem:[#allocation5 + $0x178] sm:$0xff]   ;;  %v1012_v12 = vld [vmem:[#allocation5 + $0x1b0] sm:$0xff]  }
  0x3b   :  { %890 = vmatprep.subr.bf16.mxu1 %v973_v21  ;;  %687 = vmatprep.mubr.bf16.mxu1 %v91_v51  ;;  %v1014_v13 = vld [vmem:[#allocation5 + $0x1f8] sm:$0xff]  }
  0x3c   :  { %v43_v14 = vld [vmem:[#allocation2 + $0x8] sm:$0xff] }
  0x3d   :  { %869 = vmatpush3.bf16.msra.mxu0 %v974_v25  ;;  %v1015_v15 = vld [vmem:[#allocation5 + $0x138] sm:$0xff]   ;;  %v70_v16 = vrot.slane %v43_v14, %v1147_v35  ;;  %v63_v17 = vcombine.high %v43_v14, %v43_v14 }
  0x3e   :  { %891 = vmatpush3.bf16.msra.mxu1 %v975_v26  ;;  %870 = vmatprep.subr.bf16.mxu0 %v976_v27  ;;  %v1016_v18 = vld [vmem:[#allocation5 + $0x1b8] sm:$0xff]   ;;  %v793_v27 = vld [vmem:[%s1170_s2] ss:$0 sm:$0xff]  ;;  %s1095_s2 = smov [#allocation7]  }
  0x3f   :  { %892 = vmatprep.subr.bf16.mxu1 %v977_v28  ;;  %v78_v19 = vcombine.high %v70_v16, %v70_v16  ;;  %v77_v20 = vrot.slane %v63_v17, %v1147_v35  ;;  %v92_v21 = vpack.c.bf16 %v70_v16, %v70_v16  ;;  %s783_s11 = sshll.u32 %s1095_s2, 4  ;;  %s784_s11 = int_to_ptr.vmem [resolvable:$true] %s783_s11 }
  0x40   :  { %s1062_s12 = scalar_lea.vmem %s784_s11, 16  ;;  %s1066_s13 = scalar_lea.vmem %s784_s11, 32 }
  0x41   :  { %871 = vmatpush3.bf16.msra.mxu0 %v978_v31  ;;  %v93_v22 = vpack.c.bf16 %v78_v19, %v78_v19  ;;  %v79_v23 = vcombine.high %v77_v20, %v77_v20  ;;  %v94_v24 = vpack.c.bf16 %v77_v20, %v77_v20  ;;  %p1063_p2 = scmp.ne.s32.totalorder %s784_s11, %s1062_s12  ;;  %p1067_p3 = scmp.lt.s32.totalorder %s784_s11, %s784_s11 }
  0x42   :  { %893 = vmatpush3.bf16.msra.mxu1 %v979_v32  ;;  %872 = vmatprep.subr.bf16.mxu0 %v980_v33  ;;  %p1068_p4 = scmp.lt.s32.totalorder %s1066_s13, %s1062_s12 }
  0x43   :  { %894 = vmatprep.subr.bf16.mxu1 %v981_v34  ;;  %v95_v25 = vpack.c.bf16 %v79_v23, %v79_v23 }
  0x44   :  { %p1069_p5 = por %p1068_p4, %p1067_p3 }
  0x45   :  { %873 = vmatpush3.bf16.msra.mxu0 %v982_v36 }
  0x46   :  { %895 = vmatpush3.bf16.msra.mxu1 %v983_v37  ;;  %902 = vmatprep.subr.bf16.mxu0 %v985_v41  ;;  %p1070_p6 = pnand %p1069_p5, %p1063_p2 }
  0x47   :  { %924 = vmatprep.subr.bf16.mxu1 %v986_v42 }
  0x48   :  { %648 = vmatmul.mubr.bf16.vlgmr.msra.gmra.mrb[0].mxu0 %v88_v45 }
  0x49   :  { %903 = vmatpush3.bf16.msra.mxu0 %v987_v48  ;;  %688 = vmatmul.mubr.bf16.vlgmr.msra.gmra.mrb[0].mxu1 %v90_v49 }
  0x4a   :  { %904 = vmatprep.subr.bf16.mxu0 %v989_v50  ;;  %925 = vmatpush3.bf16.msra.mxu1 %v988_v52 }
  0x4b   :  { %926 = vmatprep.subr.bf16.mxu1 %v990_v53  ;;  %727 = vmatprep.mubr.bf16.mxu0 %v93_v22 }
  0x4c   :  { %767 = vmatprep.mubr.bf16.mxu1 %v95_v25 }
  0x4d   :  { %905 = vmatpush3.bf16.msra.mxu0 %v991_v54 }
  0x4e   :  { %906 = vmatprep.subr.bf16.mxu0 %v993_v55  ;;  %927 = vmatpush3.bf16.msra.mxu1 %v992_v56 }
  0x4f   :  { %928 = vmatprep.subr.bf16.mxu1 %v994_v57 }
  0x51   :  { %907 = vmatpush3.bf16.msra.mxu0 %v995_v58 }
  0x52   :  { %908 = vmatprep.subr.bf16.mxu0 %v997_v59  ;;  %929 = vmatpush3.bf16.msra.mxu1 %v996_v60 }
  0x53   :  { %930 = vmatprep.subr.bf16.mxu1 %v998_v61 }
  0x55   :  { %909 = vmatpush3.bf16.msra.mxu0 %v999_v62 }
  0x56   :  { %910 = vmatprep.subr.bf16.mxu0 %v1001_v63  ;;  %931 = vmatpush3.bf16.msra.mxu1 %v1000_v0 }
  0x57   :  { %932 = vmatprep.subr.bf16.mxu1 %v1002_v1 }
  0x59   :  { %911 = vmatpush3.bf16.msra.mxu0 %v1003_v2 }
  0x5a   :  { %912 = vmatprep.subr.bf16.mxu0 %v1005_v3  ;;  %933 = vmatpush3.bf16.msra.mxu1 %v1004_v4 }
  0x5b   :  { %934 = vmatprep.subr.bf16.mxu1 %v1006_v5 }
  0x5d   :  { %913 = vmatpush3.bf16.msra.mxu0 %v1007_v6 }
  0x5e   :  { %914 = vmatprep.subr.bf16.mxu0 %v1009_v7  ;;  %935 = vmatpush3.bf16.msra.mxu1 %v1008_v8 }
  0x5f   :  { %936 = vmatprep.subr.bf16.mxu1 %v1010_v9 }
  0x61   :  { %915 = vmatpush3.bf16.msra.mxu0 %v1011_v10 }
  0x62   :  { %916 = vmatprep.subr.bf16.mxu0 %v1013_v11  ;;  %937 = vmatpush3.bf16.msra.mxu1 %v1012_v12 }
  0x63   :  { %938 = vmatprep.subr.bf16.mxu1 %v1014_v13 }
  0x65   :  { %917 = vmatpush3.bf16.msra.mxu0 %v1015_v15 }
  0x66   :  { %939 = vmatpush3.bf16.msra.mxu1 %v1016_v18 }
  0x68   :  { %728 = vmatmul.mubr.bf16.vlgmr.msra.gmra.mrb[4].mxu0 %v92_v21 }
  0x69   :  { %768 = vmatmul.mubr.bf16.vlgmr.msra.gmra.mrb[4].mxu1 %v94_v24 }
 0x11b   :  { %v874_v26 = vpop.f32.mrb[0].mxu0 }
 0x11c   :  { %v875_v28 = vpop.f32.mrb[1].mxu0  ;;  %v896_v29 = vpop.f32.mrb[0].mxu1 }
 0x11d   :  { %v876_v30 = vadd.f32 %v875_v28, %v874_v26  ;;  %v877_v31 = vpop.f32.mrb[2].mxu0  ;;  %v897_v32 = vpop.f32.mrb[1].mxu1 }
 0x11e   :  { %v878_v33 = vpop.f32.mrb[3].mxu0  ;;  %v898_v35 = vadd.f32 %v897_v32, %v896_v29  ;;  %v899_v36 = vpop.f32.mrb[2].mxu1 }
 0x11f   :  { %v650_v34 = vadd.f32 %v876_v30, %v793_v27  ;;  %v900_v37 = vpop.f32.mrb[3].mxu1 }
 0x121   :  { %v690_v38 = vadd.f32 %v898_v35, %v650_v34 }
 0x13b   :  { %v918_v39 = vpop.f32.mrb[4].mxu0 }
 0x13c   :  { %v919_v40 = vpop.f32.mrb[5].mxu0  ;;  %v940_v41 = vpop.f32.mrb[4].mxu1 }
 0x13d   :  { %v920_v42 = vadd.f32 %v919_v40, %v918_v39  ;;  %v921_v43 = vpop.f32.mrb[6].mxu0  ;;  %v941_v44 = vpop.f32.mrb[5].mxu1 }
 0x13e   :  { %v922_v45 = vpop.f32.mrb[7].mxu0  ;;  %v942_v47 = vadd.f32 %v941_v44, %v940_v41  ;;  %v943_v48 = vpop.f32.mrb[6].mxu1 }
 0x13f   :  { %v730_v46 = vadd.f32 %v920_v42, %v690_v38  ;;  %v944_v49 = vpop.f32.mrb[7].mxu1 }
 0x141   :  { %v770_v50 = vadd.f32 %v942_v47, %v730_v46 }
 0x143   :  { %v775_v51 = vpack.c.bf16 %v770_v50, %v770_v50 }
 0x145   :  { %776 = vst [vmem:[#allocation7] sm:$0x1] %v775_v51 }
 0x146   :  { %1073 = shalt.err (!%p1070_p6)
}
 0x147   :  { %s1074_s16 = scalar_lea.hbm %s1171_s3, 16 }
 0x148   :  { %p1075_p7 = scmp.ne.s32.totalorder %s1171_s3, %s1074_s16  ;;  %p1078_p8 = scmp.lt.u32.totalorder %s1074_s16, %s1171_s3 }
 0x14a   :  { %p1080_p9 = pnand %p1078_p8, %p1075_p7 }
 0x14c   :  { %1083 = shalt.err (!%p1080_p9)
}
 0x14d   :  { %786 = dma.vmem_to_hbm [thread:$0]  %s784_s11, 16, %s1171_s3, [#allocation4]  }
 0x14e   :  { %1088 = dma.done.wait [#allocation4], 16  }
 0x14f   :  { %1089 = vsyncadd [#allocation4], 4294967280 }
 0x150   :  { %790 = vsyncpa [#allocation3], 1 }
 0x151   :  { %791 = vsyncpa [#allocation6], 1 }
 0x152   :  { %792 = vsyncpa [#allocation4], 1 }

</bundles_post_ra>
